<compile_context>
chip_gen: v7x
topology: tpu7x:2x2x1
jax: 0.10.0
libtpu: 0.0.40
codegen_flags: <defaults>
</compile_context>

<pallas_src>
import functools
import numpy as np
import jax
import jax.numpy as jnp
from jax.experimental import pallas as pl
from jax.experimental.pallas import tpu as pltpu


# --------------------------- padding / tiling helpers ------------------------

def _round_up(x, m):
    return (x + m - 1) // m * m


def _pad_n(n):
    # Output/N dim: always a multiple of 128 -> lane-dense (unmasked) stores.
    return max(128, _round_up(n, 128))


def _pad_k(k, kh=1, kw=1):
    # K is the lane dim of the A block: keep it either <128 (used as a full-dim
    # block), a multiple of 128, or the exact 9*C tap layout for 3x3 convs.
    if k < 128 or k % 128 == 0:
        return k
    if kh == 3 and kw == 3:
        return k                      # tap layout keeps K = 9*C exactly
    return _round_up(k, 128)


def _select_tiles(M, Kp, Np):
    """Desired-tile-first selection; pads M up to the tile instead of collapsing."""
    tm = 256 if M >= 256 else _round_up(M, 8)
    Mp = _round_up(M, tm)
    tiny_m = (Mp // tm) == 1
    if tiny_m:
        # Weight-streaming regime: big N tiles, but keep >=2 blocks on the
        # parallel j axis when N is large enough (v7x: 2 TensorCores/chip).
        tn = min(512, Np)
        if Np // tn < 2 and Np >= 512:
            tn = Np // 2
    else:
        tn = min(256, Np)
    if Kp <= 512:
        tk = Kp
    else:
        tk = next((d for d in (512, 384, 256, 128) if Kp % d == 0), Kp)
    return tm, Mp, tn, tk, tiny_m


# --------------------------- optional deep pipelining ------------------------

def _probe_buffered():
    """Check (once, on-device) that pl.Buffered/pipeline_mode is supported."""
    buffered = getattr(pl, "Buffered", None)
    if buffered is None:
        return False
    try:
        def k(x_ref, o_ref):
            o_ref[...] = x_ref[...] + 1.0
        x = jnp.zeros((32, 128), jnp.float32)
        f = pl.pallas_call(
            k,
            out_shape=jax.ShapeDtypeStruct((32, 128), jnp.float32),
            grid=(4,),
            in_specs=[pl.BlockSpec((8, 128), lambda i: (i, 0),
                                   pipeline_mode=buffered(3))],
            out_specs=pl.BlockSpec((8, 128), lambda i: (i, 0)),
        )
        jax.block_until_ready(f(x))
        return True
    except Exception:
        return False


_HAS_BUFFERED = _probe_buffered()


def _wspec(shape, index_map, deep):
    """Weight-operand BlockSpec; 3-deep pipelining in weight-streaming regimes."""
    if deep and _HAS_BUFFERED:
        return pl.BlockSpec(shape, index_map, pipeline_mode=pl.Buffered(3))
    return pl.BlockSpec(shape, index_map)


# --------------------------- generic fused matmul kernel ---------------------

def _matmul_kernel(a_ref, b_ref, bias_ref, *rest, relu, has_identity):
    if has_identity:
        id_ref, o_ref, acc_ref = rest
    else:
        id_ref = None
        o_ref, acc_ref = rest

    @pl.when(pl.program_id(2) == 0)
    def _():
        acc_ref[...] = jnp.zeros_like(acc_ref)

    acc_ref[...] += jnp.dot(a_ref[...], b_ref[...],
                            preferred_element_type=jnp.float32)

    @pl.when(pl.program_id(2) == pl.num_programs(2) - 1)
    def _():
        out = acc_ref[...] + bias_ref[...]
        if has_identity:
            out = out + id_ref[...].astype(jnp.float32)
        if relu:
            out = jnp.maximum(out, 0.0)
        o_ref[...] = out.astype(o_ref.dtype)


def pallas_matmul_bias(a, b, bias, *, n_out, relu, identity=None,
                       out_dtype=jnp.bfloat16):
    """(M,K) @ (K,Np) bf16 MXU matmul, f32 accumulation, fused bias(+identity)(+ReLU).

    `b` / `bias` are pre-padded (K, Np) / (1, Np) arrays built at parameter time;
    `a` must already have K columns (K-pad is folded into patch construction).
    """
    M, K = a.shape
    Kp, Np = b.shape
    assert Kp == K and bias.shape == (1, Np) and Np >= n_out

    tm, Mp, tn, tk, tiny_m = _select_tiles(M, Kp, Np)

    a = a.astype(jnp.bfloat16)
    if Mp != M:
        a = jnp.pad(a, ((0, Mp - M), (0, 0)))

    inputs = [a, b, bias]
    in_specs = [
        pl.BlockSpec((tm, tk), lambda i, j, k: (i, k)),
        _wspec((tk, tn), lambda i, j, k: (k, j), deep=tiny_m),
        pl.BlockSpec((1, tn), lambda i, j, k: (0, j)),
    ]
    if identity is not None:
        idm = identity.astype(jnp.bfloat16)
        if idm.shape != (Mp, Np):
            idm = jnp.pad(idm, ((0, Mp - idm.shape[0]), (0, Np - idm.shape[1])))
        inputs.append(idm)
        in_specs.append(pl.BlockSpec((tm, tn), lambda i, j, k: (i, j)))

    grid = (Mp // tm, Np // tn, Kp // tk)
    out = pl.pallas_call(
        functools.partial(_matmul_kernel, relu=relu,
                          has_identity=identity is not None),
        out_shape=jax.ShapeDtypeStruct((Mp, Np), out_dtype),
        grid_spec=pltpu.PrefetchScalarGridSpec(
            num_scalar_prefetch=0,
            grid=grid,
            in_specs=in_specs,
            out_specs=pl.BlockSpec((tm, tn), lambda i, j, k: (i, j)),
            scratch_shapes=[pltpu.VMEM((tm, tn), jnp.float32)],
        ),
        compiler_params=pltpu.CompilerParams(
            dimension_semantics=("parallel", "parallel", "arbitrary")),
    )(*inputs)

    if (Mp, Np) != (M, n_out):
        out = out[:M, :n_out]
    return out


# --------------------------- 3x3 stride-1 tap conv kernel --------------------

def _conv3x3_tap_kernel(x_ref, w_ref, bias_ref, o_ref, acc_ref, *,
                        Ho, Wo, C, relu):
    # x_ref: whole zero-padded activation (Nb, Ho+2, Wo+2, C), resident in VMEM
    # (constant block index -> fetched once). Grid axis 1 is the dy tap; the 3
    # dx taps are accumulated here against the (3C, tn) weight chunk.
    dy = pl.program_id(1)

    @pl.when(dy == 0)
    def _():
        acc_ref[...] = jnp.zeros_like(acc_ref)

    for dyv in range(3):
        @pl.when(dy == dyv)
        def _(dyv=dyv):
            for dx in range(3):
                win = x_ref[:, dyv:dyv + Ho, dx:dx + Wo, :]
                a = win.reshape(-1, C)
                acc_ref[...] += jnp.dot(a, w_ref[dx * C:(dx + 1) * C, :],
                                        preferred_element_type=jnp.float32)

    @pl.when(dy == 2)
    def _():
        out = acc_ref[...] + bias_ref[...]
        if relu:
            out = jnp.maximum(out, 0.0)
        o_ref[...] = out.astype(o_ref.dtype)


def conv3x3_bn_tap(x, p, relu=True):
    """3x3 / stride-1 / pad-1 conv + folded BN (+ReLU) without im2col patches."""
    Nb, H, W, C = x.shape
    cout = p["cout"]
    Kp, Np = p["w"].shape
    assert Kp == 9 * C
    Ho, Wo = H, W
    M = Nb * Ho * Wo

    xp = jnp.pad(x.astype(jnp.bfloat16), ((0, 0), (1, 1), (1, 1), (0, 0)))

    tn = Np // 2 if Np >= 256 else Np       # >=2 parallel j blocks when possible
    grid = (Np // tn, 3)
    out = pl.pallas_call(
        functools.partial(_conv3x3_tap_kernel, Ho=Ho, Wo=Wo, C=C, relu=relu),
        out_shape=jax.ShapeDtypeStruct((M, Np), jnp.bfloat16),
        grid_spec=pltpu.PrefetchScalarGridSpec(
            num_scalar_prefetch=0,
            grid=grid,
            in_specs=[
                pl.BlockSpec((Nb, Ho + 2, Wo + 2, C),
                             lambda j, k: (0, 0, 0, 0)),
                _wspec((3 * C, tn), lambda j, k: (k, j), deep=True),
                pl.BlockSpec((1, tn), lambda j, k: (0, j)),
            ],
            out_specs=pl.BlockSpec((M, tn), lambda j, k: (0, j)),
            scratch_shapes=[pltpu.VMEM((M, tn), jnp.float32)],
        ),
        compiler_params=pltpu.CompilerParams(
            dimension_semantics=("parallel", "arbitrary")),
    )(xp, p["w"], p["b"])

    if cout != Np:
        out = out[:, :cout]
    return out.reshape(Nb, Ho, Wo, cout)


# --------------------------- fused avgpool + embed kernel --------------------

def _pool_embed_kernel(x_ref, w_ref, bias_ref, o_ref, acc_ref):
    k = pl.program_id(1)

    @pl.when(k == 0)
    def _():
        acc_ref[...] = jnp.zeros_like(acc_ref)

    feat = jnp.mean(x_ref[...].astype(jnp.float32), axis=1)        # (N, tk)
    acc_ref[...] += jnp.dot(feat.astype(jnp.bfloat16), w_ref[...],
                            preferred_element_type=jnp.float32)

    @pl.when(k == pl.num_programs(1) - 1)
    def _():
        o_ref[...] = acc_ref[...] + bias_ref[...]


def pallas_pool_embed(x, w, bias, n_out):
    """Fused adaptive-avg-pool(1x1) + flatten + Linear: one kernel, one HBM pass."""
    Nb, S, C = x.shape
    Cp, Np = w.shape
    assert Cp == C and bias.shape == (1, Np)
    tk = 512 if C % 512 == 0 else C
    tn = min(512, Np)
    grid = (Np // tn, C // tk)
    out = pl.pallas_call(
        _pool_embed_kernel,
        out_shape=jax.ShapeDtypeStruct((Nb, Np), jnp.float32),
        grid_spec=pltpu.PrefetchScalarGridSpec(
            num_scalar_prefetch=0,
            grid=grid,
            in_specs=[
                pl.BlockSpec((Nb, S, tk), lambda j, k: (0, 0, k)),
                _wspec((tk, tn), lambda j, k: (k, j), deep=True),
                pl.BlockSpec((1, tn), lambda j, k: (0, j)),
            ],
            out_specs=pl.BlockSpec((Nb, tn), lambda j, k: (0, j)),
            scratch_shapes=[pltpu.VMEM((Nb, tn), jnp.float32)],
        ),
        compiler_params=pltpu.CompilerParams(
            dimension_semantics=("parallel", "arbitrary")),
    )(x.astype(jnp.bfloat16), w, bias)
    return out[:, :n_out]


# --------------------------- JAX glue (layout / im2col / pooling) ------------

def _im2col(x, kh, kw, stride, pad, k_pad_to):
    # (N,H,W,C) -> (N,Ho,Wo, kh*kw*C [+ zero-fill to k_pad_to]).  The K zero-pad
    # is folded into the concatenate so no separate pad pass over the patches.
    if pad > 0:
        x = jnp.pad(x, ((0, 0), (pad, pad), (pad, pad), (0, 0)))
    N, H, W, C = x.shape
    Ho = (H - kh) // stride + 1
    Wo = (W - kw) // stride + 1
    cols = []
    for dy in range(kh):
        for dx in range(kw):
            cols.append(x[:, dy:dy + stride * Ho:stride,
                          dx:dx + stride * Wo:stride, :])
    k = kh * kw * C
    if k_pad_to > k:
        cols.append(jnp.zeros((N, Ho, Wo, k_pad_to - k), x.dtype))
    return jnp.concatenate(cols, axis=-1)


def conv_bn(x, p, stride, pad, relu, identity=None, out_dtype=jnp.bfloat16):
    # conv (no bias) + folded eval-mode BatchNorm (+ optional residual + ReLU)
    kh, kw, cout = p["kh"], p["kw"], p["cout"]
    Kp = p["w"].shape[0]
    if kh == 1 and kw == 1 and pad == 0:
        patches = x[:, ::stride, ::stride, :]            # 1x1 conv: no duplication
    else:
        patches = _im2col(x, kh, kw, stride, pad, Kp)
    Nb, Ho, Wo, K = patches.shape
    a = patches.reshape(Nb * Ho * Wo, K)
    idm = None if identity is None else identity.reshape(Nb * Ho * Wo, cout)
    y = pallas_matmul_bias(a, p["w"], p["b"], n_out=cout, relu=relu,
                           identity=idm, out_dtype=out_dtype)
    return y.reshape(Nb, Ho, Wo, cout)


def maxpool_3x3_s2(x):
    # nn.MaxPool2d(kernel_size=3, stride=2, padding=1), -inf padding semantics.
    N, H, W, C = x.shape
    xp = jnp.pad(x, ((0, 0), (1, 1), (1, 1), (0, 0)), constant_values=-jnp.inf)
    Ho = (H + 2 - 3) // 2 + 1
    Wo = (W + 2 - 3) // 2 + 1
    out = None
    for dy in range(3):
        for dx in range(3):
            v = xp[:, dy:dy + 2 * Ho:2, dx:dx + 2 * Wo:2, :]
            out = v if out is None else jnp.maximum(out, v)
    return out


def bottleneck(x, p, stride):
    out = conv_bn(x, p["conv1"], 1, 0, relu=True)                  # 1x1
    if stride == 1 and out.shape[2] % 8 == 0:
        out = conv3x3_bn_tap(out, p["conv2"], relu=True)           # 3x3 tap kernel
    else:
        out = conv_bn(out, p["conv2"], stride, 1, relu=True)       # 3x3 im2col
    if "down" in p:
        identity = conv_bn(x, p["down"], stride, 0, relu=False)
    else:
        identity = x
    # conv3 1x1 with residual add + ReLU fused into the matmul epilogue
    return conv_bn(out, p["conv3"], 1, 0, relu=True, identity=identity)


def encoder_cnn_forward(images_nchw, params):
    """EncoderCNN.forward: resnet50[:-1](images) -> flatten -> Linear."""
    x = jnp.transpose(images_nchw, (0, 2, 3, 1)).astype(jnp.bfloat16)  # NCHW->NHWC
    x = conv_bn(x, params["conv1"], stride=2, pad=3, relu=True)        # conv1+bn1+relu
    x = maxpool_3x3_s2(x)                                              # maxpool
    for layer in params["layers"]:                                     # layer1..layer4
        for blk in layer:
            x = bottleneck(x, blk["p"], blk["stride"])
    Nb, H, W, C = x.shape
    out = pallas_pool_embed(x.reshape(Nb, H * W, C),                   # avgpool+flatten
                            params["embed_w"], params["embed_b"],      # +Linear, fused
                            params["embed_n"])
    return out


# --------------------------- deterministic parameters ------------------------

class ParamGen:
    def __init__(self, seed=0):
        self._key = jax.random.PRNGKey(seed)
        self._i = 0

    def _next(self):
        k = jax.random.fold_in(self._key, self._i)
        self._i += 1
        return k

    def normal(self, shape, scale=1.0):
        return scale * jax.random.normal(self._next(), shape, dtype=jnp.float32)

    def uniform(self, shape, lo, hi):
        return jax.random.uniform(self._next(), shape, jnp.float32, lo, hi)


def make_conv_bn_params(g, kh, kw, cin, cout):
    # conv weight with eval-mode BN folded; stored pre-reshaped, pre-padded, bf16.
    w = g.normal((kh, kw, cin, cout), scale=1.0 / np.sqrt(kh * kw * cin))
    gamma = g.uniform((cout,), 0.9, 1.1)
    beta = g.normal((cout,), scale=0.01)
    rmean = g.normal((cout,), scale=0.01)
    rvar = g.uniform((cout,), 0.9, 1.1)
    scale = gamma / jnp.sqrt(rvar + 1e-5)
    w_f = (w * scale).reshape(kh * kw * cin, cout)   # (dy, dx, c)-major: matches both paths
    b_f = beta - rmean * scale
    K, N = kh * kw * cin, cout
    Kp, Np = _pad_k(K, kh, kw), _pad_n(N)
    w_p = jnp.zeros((Kp, Np), jnp.bfloat16).at[:K, :N].set(w_f.astype(jnp.bfloat16))
    b_p = jnp.zeros((1, Np), jnp.float32).at[0, :N].set(b_f)
    return {"w": w_p, "b": b_p, "kh": kh, "kw": kw, "cout": cout}


def make_bottleneck_params(g, cin, cmid, cout, downsample):
    p = {"conv1": make_conv_bn_params(g, 1, 1, cin, cmid),
         "conv2": make_conv_bn_params(g, 3, 3, cmid, cmid),
         "conv3": make_conv_bn_params(g, 1, 1, cmid, cout)}
    if downsample:
        p["down"] = make_conv_bn_params(g, 1, 1, cin, cout)
    return p


def make_encoder_params(embed_size, seed=0):
    g = ParamGen(seed)
    params = {"conv1": make_conv_bn_params(g, 7, 7, 3, 64)}
    # ResNet-50: bottleneck blocks [3, 4, 6, 3]
    cfg = [(64, 256, 3, 1), (128, 512, 4, 2), (256, 1024, 6, 2), (512, 2048, 3, 2)]
    cin = 64
    layers = []
    for cmid, cout, nblocks, stride in cfg:
        blocks = []
        for b in range(nblocks):
            blocks.append({
                "p": make_bottleneck_params(g, cin if b == 0 else cout,
                                            cmid, cout, downsample=(b == 0)),
                "stride": stride if b == 0 else 1,
            })
        cin = cout
        layers.append(blocks)
    params["layers"] = layers

    K, N = 2048, embed_size
    Kp, Np = _pad_k(K), _pad_n(N)
    w = g.normal((K, N), scale=1.0 / np.sqrt(K))
    b = g.normal((N,), scale=0.01)
    params["embed_w"] = jnp.zeros((Kp, Np), jnp.bfloat16).at[:K, :N].set(
        w.astype(jnp.bfloat16))
    params["embed_b"] = jnp.zeros((1, Np), jnp.float32).at[0, :N].set(b)
    params["embed_n"] = embed_size
    return params


# --------------------------- main --------------------------------------------

if __name__ == "__main__":
    embed_size = 32
    batch, spatial = 2, 64          # 64x64 keeps all 5 downsampling stages valid
    images = jax.random.normal(jax.random.PRNGKey(0),
                               (batch, 3, spatial, spatial), dtype=jnp.float32)
    params = make_encoder_params(embed_size, seed=0)
    feats = encoder_cnn_forward(images, params)
    feats = jax.block_until_ready(feats)
    assert feats.shape == (batch, embed_size), feats.shape
    assert bool(jnp.all(jnp.isfinite(feats)))
    print("KERNEL_OK")
</pallas_src>

<mosaic_0001>
module attributes {stable_mosaic.version = 11 : i64} {
  func.func @_matmul_kernel(%arg0: i32, %arg1: i32, %arg2: i32, %arg3: memref<256x256xbf16, #tpu.memory_space<vmem>>, %arg4: memref<256x128xbf16, #tpu.memory_space<vmem>>, %arg5: memref<1x128xf32, #tpu.memory_space<vmem>>, %arg6: memref<256x128xbf16, #tpu.memory_space<vmem>>, %arg7: memref<256x128xf32, #tpu.memory_space<vmem>>) attributes {dimension_semantics = [#tpu.dimension_semantics<parallel>, #tpu.dimension_semantics<parallel>, #tpu.dimension_semantics<arbitrary>], iteration_bounds = array<i64: 8, 1, 1>, scalar_prefetch = 0 : i64, scratch_operands = 1 : i64, tpu.core_type = #tpu.core_type<tc>, window_params = [{transform_indices = @transform_0, window_bounds = array<i64: 256, 256>}, {transform_indices = @transform_1, window_bounds = array<i64: 256, 128>}, {transform_indices = @transform_2, window_bounds = array<i64: 1, 128>}, {transform_indices = @transform_3, window_bounds = array<i64: 256, 128>}]} {
    %c0_i32 = arith.constant 0 : i32
    %0 = arith.cmpi eq, %arg2, %c0_i32 : i32
    %1 = arith.extui %0 : i1 to i32
    %c0_i32_0 = arith.constant 0 : i32
    %2 = arith.cmpi ne, %1, %c0_i32_0 : i32
    scf.if %2 {
      %cst_10 = arith.constant 0.000000e+00 : f32
      %12 = vector.broadcast %cst_10 : f32 to vector<256x128xf32>
      %c0_11 = arith.constant 0 : index
      %c0_12 = arith.constant 0 : index
      %13 = vector.load %arg7[%c0_11, %c0_12] : memref<256x128xf32, #tpu.memory_space<vmem>>, vector<256x128xf32>
      tpu.vector_store %arg7[%c0_11, %c0_12], %12 {strides = array<i32>} : memref<256x128xf32, #tpu.memory_space<vmem>>, vector<256x128xf32>,
    } else {
    }
    %c0 = arith.constant 0 : index
    %c0_1 = arith.constant 0 : index
    %3 = vector.load %arg7[%c0, %c0_1] : memref<256x128xf32, #tpu.memory_space<vmem>>, vector<256x128xf32>
    %c0_2 = arith.constant 0 : index
    %c0_3 = arith.constant 0 : index
    %4 = vector.load %arg3[%c0_2, %c0_3] : memref<256x256xbf16, #tpu.memory_space<vmem>>, vector<256x256xbf16>
    %c0_4 = arith.constant 0 : index
    %c0_5 = arith.constant 0 : index
    %5 = vector.load %arg4[%c0_4, %c0_5] : memref<256x128xbf16, #tpu.memory_space<vmem>>, vector<256x128xbf16>
    %cst = arith.constant dense<0.000000e+00> : vector<256x128xf32>
    %6 = tpu.matmul %4, %5, %cst {dimension_numbers = #tpu.dot_dimension_numbers<[1], [0], [0], [1], [0, 0, 1, 1], [], []>} : vector<256x256xbf16>, vector<256x128xbf16>, vector<256x128xf32> -> vector<256x128xf32>
    %7 = arith.addf %3, %6 : vector<256x128xf32>
    %c0_6 = arith.constant 0 : index
    %c0_7 = arith.constant 0 : index
    %8 = vector.load %arg7[%c0_6, %c0_7] : memref<256x128xf32, #tpu.memory_space<vmem>>, vector<256x128xf32>
    tpu.vector_store %arg7[%c0_6, %c0_7], %7 {strides = array<i32>} : memref<256x128xf32, #tpu.memory_space<vmem>>, vector<256x128xf32>,
    %c0_i32_8 = arith.constant 0 : i32
    %9 = arith.cmpi eq, %arg2, %c0_i32_8 : i32
    %10 = arith.extui %9 : i1 to i32
    %c0_i32_9 = arith.constant 0 : i32
    %11 = arith.cmpi ne, %10, %c0_i32_9 : i32
    scf.if %11 {
      %c0_10 = arith.constant 0 : index
      %c0_11 = arith.constant 0 : index
      %12 = vector.load %arg7[%c0_10, %c0_11] : memref<256x128xf32, #tpu.memory_space<vmem>>, vector<256x128xf32>
      %c0_12 = arith.constant 0 : index
      %c0_13 = arith.constant 0 : index
      %13 = vector.load %arg5[%c0_12, %c0_13] : memref<1x128xf32, #tpu.memory_space<vmem>>, vector<1x128xf32>
      %14 = vector.broadcast %13 : vector<1x128xf32> to vector<256x128xf32>
      %15 = arith.addf %12, %14 : vector<256x128xf32>
      %cst_14 = arith.constant 0.000000e+00 : f32
      %16 = vector.broadcast %cst_14 : f32 to vector<256x128xf32>
      %17 = arith.maximumf %15, %16 : vector<256x128xf32>
      %18 = arith.truncf %17 : vector<256x128xf32> to vector<256x128xbf16>
      %c0_15 = arith.constant 0 : index
      %c0_16 = arith.constant 0 : index
      %19 = vector.load %arg6[%c0_15, %c0_16] : memref<256x128xbf16, #tpu.memory_space<vmem>>, vector<256x128xbf16>
      tpu.vector_store %arg6[%c0_15, %c0_16], %18 {strides = array<i32>} : memref<256x128xbf16, #tpu.memory_space<vmem>>, vector<256x128xbf16>,
    } else {
    }
    return
  }
  func.func @transform_0(%arg0: i32, %arg1: i32, %arg2: i32) -> (i32, i32) {
    %c0_i32 = arith.constant 0 : i32
    return %arg0, %arg2 : i32, i32
  }
  func.func @transform_1(%arg0: i32, %arg1: i32, %arg2: i32) -> (i32, i32) {
    %c0_i32 = arith.constant 0 : i32
    return %arg2, %arg1 : i32, i32
  }
  func.func @transform_2(%arg0: i32, %arg1: i32, %arg2: i32) -> (i32, i32) {
    %c0_i32 = arith.constant 0 : i32
    %c0_i32_0 = arith.constant 0 : i32
    return %c0_i32, %arg1 : i32, i32
  }
  func.func @transform_3(%arg0: i32, %arg1: i32, %arg2: i32) -> (i32, i32) {
    %c0_i32 = arith.constant 0 : i32
    return %arg0, %arg1 : i32, i32
  }
}

</mosaic_0001>

<bundles_post_ra>
// kernel: tpu_custom_call.1
= control target key start
LH: loop header
LB: loop body
LE: loop exit
PB: predicated region body
PF: predicated region fallthrough
CT: control target
= control target key end

     0   :  { %8 = vsyncpa [#allocation4], 0  ;;  %s2253_s0 = inlined_call_operand.hbm [shape: bf16[2048,256], index: 0, kind: input, shape index: {}]   ;;  %s2254_s1 = inlined_call_operand.hbm [shape: bf16[256,128], index: 1, kind: input, shape index: {}]   ;;  %s2255_s2 = inlined_call_operand.vmem [shape: f32[1,128], index: 2, kind: input, shape index: {}]   ;;  %s2256_s3 = inlined_call_operand.hbm [shape: bf16[2048,128], index: 3, kind: output, shape index: {}]  }
   0x1   :  { %10 = vsyncpa [#allocation4 + $0x1], 0 }
   0x2   :  { %11 = vsyncpa [#allocation7], 0 }
   0x3   :  { %12 = vsyncpa [#allocation5], 0 }
   0x4   :  { %14 = vsyncpa [#allocation5 + $0x1], 0  ;;  %s1945_s12 = smov 0   ;;  %s1947_s13 = smov 0  }
   0x5   :  { %s1949_s14 = smov 0   ;;  %s1951_s15 = smov 0  }
   0x6   :  { %s1953_s16 = smov 0   ;;  %s1955_s17 = smov 0  }
   0x7 LB: > { %s1269_s18 = sadd.s32 4294967295, %s1914_s17   ;;  %s1270_s19 = sadd.s32 4294967294, %s1914_s17   ;;  %s1914_s17 = sphi %s1955_s17, %s20_s17   ;;  %s1910_s16 = sphi %s1953_s16, %s2279_s16   ;;  %s1906_s15 = sphi %s1951_s15, %s2278_s15   ;;  %s1902_s14 = sphi %s1949_s14, %s2277_s14   ;;  %s1898_s13 = sphi %s1947_s13, %s2276_s13   ;;  %s1894_s12 = sphi %s1945_s12, %s2275_s12  }
   0x8   : > { %p61_p0 = scmp.ne.s32.totalorder %s1898_s13, %s1894_s12  ;;  %p1979_p1 = scmp.eq.s32.totalorder %s1269_s18, 0 }
   0x9   : > { %p1983_p2 = scmp.eq.s32.totalorder %s1269_s18, 7  ;;  %p147_p3 = scmp.eq.s32.totalorder %s1270_s19, 7 }
   0xa   : > { %s2261_s20 = scalar_select %p1979_p1, 1, 0 }
   0xb   : > { %s2262_s21 = scalar_select %p1983_p2, 1, 0 }
   0xc   : > { %p1989_p4 = por %p1979_p1, %p61_p0  ;;  %p1271_p5 = scmp.ge.s32.totalorder %s1914_s17, 1 }
   0xd   : > { %p1994_p6 = por %p147_p3, %p61_p0  ;;  %p154_p7 = scmp.lt.s32.totalorder %s1914_s17, 9 }
   0xe   : > { %s2263_s22 = scalar_select %p1989_p4, 1, 0 }
   0xf   : > { %s2264_s23 = scalar_select %p1994_p6, 1, 0 }
  0x10   : > { %p1999_p8 = pnand %p1271_p5, %p154_p7  ;;  %s1916_s25 = smov [#allocation6]  }
  0x11   : > { %s170_s26 = sshll.u32 %s1916_s25, 4  ;;  %s39_s28 = sadd.s32 1, %s1910_s16  ;;  %s171_s26 = int_to_ptr.vmem [resolvable:$true] %s170_s26 }
  0x12   : > { %s2265_s24 = scalar_select %p1999_p8, 1, 0 }
  0x13   : > { %p1635_p9 = pneg %p1999_p8  ;;  %s1770_s4 = scalar_lea.hbm %s2254_s1, 2048 }
  0x14   : > { %p1771_p11 = scmp.ne.s32.totalorder %s2254_s1, %s1770_s4  ;;  %p1777_p3 = scmp.lt.u32.totalorder %s1770_s4, %s2254_s1 }
  0x15   : > { %p2007_p10 = pnand %p1635_p9, %p1979_p1 }
  0x17   : > { %p1772_p12 = pneg %p2007_p10 }
  0x19   : > { %p1773_p13 = pnand %p1772_p12, %p1771_p11 }
  0x1b   : > { %p1774_p0 = pneg %p1773_p13 }
  0x1d   : > { %p1779_p5 = pnand %p1777_p3, %p1774_p0 }
  0x1f   : > { %1782 = shalt.err (!%p1779_p5)
}
  0x20   : > { %s1783_s9 = scalar_lea.vmem %s171_s26, 2048  ;;  %p1791_p1 = scmp.lt.s32.totalorder %s171_s26, %s171_s26 }
  0x21   : > { %p1784_p7 = scmp.ne.s32.totalorder %s171_s26, %s1783_s9  ;;  %p1792_p4 = scmp.lt.s32.totalorder %s1783_s9, %s1783_s9 }
  0x23   : > { %p1786_p9 = pnand %p1784_p7, %p1772_p12  ;;  %p1793_p8 = por %p1792_p4, %p1791_p1 }
  0x25   : > { %p1787_p6 = pneg %p1786_p9 }
  0x27   : > { %p1794_p2 = pnand %p1793_p8, %p1787_p6 }
  0x29   : > { %1797 = shalt.err (!%p1794_p2)
}
  0x2a   : > { %s1917_s10 = smov 64   ;;  %s1918_s11 = smov 4  }
  0x2b   : > { %1638 = dma.hbm_to_vmem [thread:$0]  (!%p2007_p10), %s2254_s1, 2048, %s171_s26, [#allocation7], %s1917_s10, %s1917_s10, %s1918_s11  }
  0x2c   : > { %p41_p1 = scmp.ge.s32.totalorder %s39_s28, 8  ;;  %s48_s25 = sadd.s32 1, %s1902_s14 }
  0x2d   : > { %p55_p2 = scmp.ne.s32.totalorder %s1902_s14, %s1898_s13  ;;  %p56_p4 = scmp.eq.s32.totalorder %s1914_s17, 0 }
  0x2e   : > { %s2281_s28 = smov (%p41_p1, %s39_s28), 0  ;;  %p2268_p8 = scmp.ne.s32.totalorder %s2262_s21, 0 }
  0x2f   : > { %p2034_p6 = por %p56_p4, %p55_p2  ;;  %s43_s27 = ssub.s32 %s1910_s16, %s2281_s28 }
  0x30   : > { %p2040_p11 = por %p2268_p8, %p55_p2  ;;  %p1648_p12 = scmp.lt.s32.totalorder %s1914_s17, 8 }
  0x31   : > { %p46_p10 = scmp.eq.s32.totalorder %s43_s27, 0  ;;  %s190_s26 = sand.u32 1, %s1902_s14  }
  0x32   : > { %s1275_s4 = sshll.u32 %s190_s26, 8  ;;  %s1370_s6 = sshll.u32 %s1910_s16, 12 }
  0x33   : > { %s2049_s5 = scalar_select %p46_p10, %s1902_s14, %s48_s25  }
  0x34   : > { %s2055_s9 = scalar_lea.hbm %s2253_s0, %s1370_s6  ;;  %s194_s21 = scalar_lea.vmem [#allocation3], %s1275_s4 }
  0x35   : > { %s204_s10 = sshll.u32 %s194_s21, 4  ;;  %p2061_p13 = pnand %p1648_p12, %p2034_p6  ;;  %s2057_s10 = int_to_ptr.vmem [resolvable:$true] %s204_s10 }
  0x36   : > { %s2065_s18 = scalar_lea.sflag [#allocation4], %s190_s26  ;;  %s1798_s19 = scalar_lea.hbm %s2055_s9, 4096 }
  0x37   : > { %p1799_p0 = scmp.ne.s32.totalorder %s2055_s9, %s1798_s19  ;;  %p1800_p3 = pneg %p2061_p13 }
  0x38   : > { %s1803_s29 = scalar_lea.hbm %s2253_s0, 32768  ;;  %p1804_p9 = scmp.lt.u32.totalorder %s2055_s9, %s2253_s0 }
  0x39   : > { %p1801_p5 = pnand %p1800_p3, %p1799_p0  ;;  %p1805_p1 = scmp.lt.u32.totalorder %s1803_s29, %s1798_s19 }
  0x3a   : > { %p1807_p4 = scmp.lt.u32.totalorder %s1798_s19, %s2055_s9 }
  0x3b   : > { %p1802_p7 = pneg %p1801_p5  ;;  %p1806_p2 = por %p1805_p1, %p1804_p9 }
  0x3d   : > { %p1808_p6 = por %p1807_p4, %p1806_p2 }
  0x3f   : > { %p1809_p8 = pnand %p1808_p6, %p1802_p7 }
  0x41   : > { %1812 = shalt.err (!%p1809_p8)
}
  0x42   : > { %s1813_s26 = scalar_lea.vmem %s2057_s10, 4096  ;;  %s1919_s7 = smov [#allocation3]  }
  0x43   : > { %p1814_p12 = scmp.ne.s32.totalorder %s2057_s10, %s1813_s26  ;;  %s1818_s8 = sshll.u32 %s1919_s7, 4  ;;  %s1819_s8 = int_to_ptr.vmem [resolvable:$false] %s1818_s8 }
  0x44   : > { %s1820_s21 = scalar_lea.vmem %s1819_s8, 8192  ;;  %p1821_p5 = scmp.lt.s32.totalorder %s2057_s10, %s1819_s8 }
  0x45   : > { %p1816_p10 = pnand %p1814_p12, %p1800_p3  ;;  %p1822_p9 = scmp.lt.s32.totalorder %s1820_s21, %s1813_s26 }
  0x47   : > { %p1817_p0 = pneg %p1816_p10  ;;  %p1823_p1 = por %p1822_p9, %p1821_p5 }
  0x49   : > { %p1824_p2 = pnand %p1823_p1, %p1817_p0 }
  0x4b   : > { %1827 = shalt.err (!%p1824_p2)
}
  0x4c   : > { %s1920_s19 = smov 128   ;;  %s1921_s25 = smov 8  }
  0x4d   : > { %1642 = dma.hbm_to_vmem [thread:$0]  (!%p2061_p13), %s2055_s9, 4096, %s2057_s10, %s2065_s18, %s1920_s19, %s1920_s19, %s1921_s25  }
  0x4e   : > { %p2271_p3 = scmp.ne.s32.totalorder %s2265_s24, 0 }
  0x4f   : > { %s2096_s27 = sand.u32 (!%p2271_p3), 1, %s1898_s13   ;;  %p2272_p7 = scmp.ne.s32.totalorder (!%p2271_p3), %s2263_s22, 0 }
  0x50   : > { %216 = sbr.rel (%p2271_p3) target bundleno = 419 (0x1a3), region = 32  ;;  %s1280_s29 = sshll.u32 (!%p2271_p3), %s2096_s27, 8 }
  0x51   : > { %s219_s4 = scalar_lea.sflag (!%p2271_p3), [#allocation4], %s2096_s27  ;;  %s2100_s6 = scalar_lea.vmem (!%p2271_p3), [#allocation3], %s1280_s29 }
  0x57   : > { %1881 = dma.done.wait (%p2272_p7), %s219_s4, 4096  }
  0x58   : > { %1883 = vsyncadd (%p2272_p7), %s219_s4, 4294963200  ;;  %p2273_p13 = scmp.ne.s32.totalorder %s2261_s20, 0 }
  0x5a   : > { %1885 = dma.done.wait (%p2273_p13), [#allocation7], 2048  }
  0x5b   : > { %1887 = vsyncadd (%p2273_p13), [#allocation7], 4294965248  ;;  %v1706_v0 = vld [vmem:[#allocation6 + $0x40] sm:$0xff]   ;;  %v1708_v2 = vld [vmem:[#allocation6 + $0x48] sm:$0xff]   ;;  %s1282_s24 = sshll.u32 %s2096_s27, 7  ;;  %s1403_s10 = sshll.u32 %s1906_s15, 11 }
  0x5c   : > { %v1707_v1 = vld [vmem:[#allocation6] sm:$0xff]   ;;  %1499 = vmatprep.subr.bf16.mxu0 %v1706_v0  ;;  %1611 = vmatprep.subr.bf16.mxu1 %v1706_v0  ;;  %v1709_v3 = vld [vmem:[#allocation6 + $0x8] sm:$0xff]   ;;  %v1710_v4 = vld [vmem:[#allocation6 + $0x50] sm:$0xff]   ;;  %s2152_s9 = scalar_lea.vmem [#allocation8], %s1282_s24  ;;  %s2201_s7 = scalar_lea.hbm %s2256_s3, %s1403_s10 }
  0x5d   : > { %1500 = vmatpush3.bf16.msra.mxu0 %v1707_v1  ;;  %1619 = vmatpush3.bf16.msra.mxu1 %v1707_v1  ;;  %v1711_v5 = vld [vmem:[#allocation6 + $0x10] sm:$0xff]   ;;  %v1712_v6 = vld [vmem:[#allocation6 + $0x58] sm:$0xff]   ;;  %v1714_v8 = vld [vmem:[#allocation6 + $0x60] sm:$0xff]   ;;  %s1154_s11 = sshll.u32 %s2152_s9, 4  ;;  %s1140_s15 = scalar_lea.sflag [#allocation5], %s2096_s27  ;;  %s2203_s11 = int_to_ptr.vmem [resolvable:$true] %s1154_s11 }
  0x5e   : > { %1501 = vmatprep.subr.bf16.mxu0 %v1708_v2  ;;  %1612 = vmatprep.subr.bf16.mxu1 %v1708_v2  ;;  %v1713_v7 = vld [vmem:[#allocation6 + $0x18] sm:$0xff]   ;;  %v1715_v9 = vld [vmem:[#allocation6 + $0x20] sm:$0xff]   ;;  %v1716_v10 = vld [vmem:[#allocation6 + $0x68] sm:$0xff]   ;;  %s1828_s8 = scalar_lea.vmem %s2203_s11, 2048  ;;  %s1922_s21 = smov [#allocation8]  }
  0x5f   : > { %v1724_v11 = vld [vmem:[%s2100_s6 + $0x4] ss:$8 sps:$4 sm:$0xff]   ;;  %v1718_v14 = vld [vmem:[#allocation6 + $0x70] sm:$0xff]   ;;  %v1720_v16 = vld [vmem:[#allocation6 + $0x78] sm:$0xff]   ;;  %p1829_p4 = scmp.ne.s32.totalorder %s2203_s11, %s1828_s8  ;;  %s1832_s19 = sshll.u32 %s1922_s21, 4  ;;  %s1833_s19 = int_to_ptr.vmem [resolvable:$false] %s1832_s19 }
  0x60   : > { %v1727_v12 = vld [vmem:[%s2100_s6 + $0x84] ss:$8 sps:$4 sm:$0xff]   ;;  %680 = vmatprep.mubr.bf16.mxu0 %v1724_v11  ;;  %v1719_v15 = vld [vmem:[#allocation6 + $0x30] sm:$0xff]   ;;  %v1721_v17 = vld [vmem:[#allocation6 + $0x38] sm:$0xff]   ;;  %s1834_s25 = scalar_lea.vmem %s1833_s19, 4096  ;;  %p1835_p12 = scmp.lt.s32.totalorder %s2203_s11, %s1833_s19 }
  0x61   : > { %1502 = vmatpush3.bf16.msra.mxu0 %v1709_v3  ;;  %1620 = vmatpush3.bf16.msra.mxu1 %v1709_v3  ;;  %v1717_v13 = vld [vmem:[#allocation6 + $0x28] sm:$0xff]   ;;  %v1728_v20 = vld [vmem:[%s2100_s6 + $0x14] ss:$8 sps:$4 sm:$0xff]   ;;  %v1732_v22 = vld [vmem:[%s2100_s6 + $0x10] ss:$8 sps:$4 sm:$0xff]   ;;  %p1830_p6 = pnand %p1829_p4, %p2040_p11  ;;  %p1836_p10 = scmp.lt.s32.totalorder %s1834_s25, %s1828_s8 }
  0x62   : > { %1503 = vmatprep.subr.bf16.mxu0 %v1710_v4  ;;  %1613 = vmatprep.subr.bf16.mxu1 %v1710_v4  ;;  %v1722_v18 = vld [vmem:[%s2100_s6] ss:$8 sps:$4 sm:$0xff]   ;;  %v1730_v21 = vld [vmem:[%s2100_s6 + $0x94] ss:$8 sps:$4 sm:$0xff]   ;;  %v1733_v23 = vld [vmem:[%s2100_s6 + $0x90] ss:$8 sps:$4 sm:$0xff]  }
  0x63   : > { %744 = vmatprep.mubr.bf16.mxu1 %v1727_v12  ;;  %v1725_v19 = vld [vmem:[%s2100_s6 + $0x80] ss:$8 sps:$4 sm:$0xff]   ;;  %v1734_v24 = vld [vmem:[%s2100_s6 + $0x24] ss:$8 sps:$4 sm:$0xff]   ;;  %v1740_v28 = vld [vmem:[%s2100_s6 + $0x34] ss:$8 sps:$4 sm:$0xff]   ;;  %p1831_p8 = pneg %p1830_p6  ;;  %p1837_p0 = por %p1836_p10, %p1835_p12 }
  0x64   : > { %v1736_v25 = vld [vmem:[%s2100_s6 + $0xa4] ss:$8 sps:$4 sm:$0xff]   ;;  %v1738_v26 = vld [vmem:[%s2100_s6 + $0x20] ss:$8 sps:$4 sm:$0xff]   ;;  %v1742_v29 = vld [vmem:[%s2100_s6 + $0xb4] ss:$8 sps:$4 sm:$0xff]  }
  0x65   : > { %1504 = vmatpush3.bf16.msra.mxu0 %v1711_v5  ;;  %1621 = vmatpush3.bf16.msra.mxu1 %v1711_v5  ;;  %v1739_v27 = vld [vmem:[%s2100_s6 + $0xa0] ss:$8 sps:$4 sm:$0xff]   ;;  %v1744_v30 = vld [vmem:[%s2100_s6 + $0x30] ss:$8 sps:$4 sm:$0xff]   ;;  %v1746_v32 = vld [vmem:[%s2100_s6 + $0x44] ss:$8 sps:$4 sm:$0xff]   ;;  %p1838_p5 = pnand %p1837_p0, %p1831_p8 }
  0x66   : > { %1505 = vmatprep.subr.bf16.mxu0 %v1712_v6  ;;  %1614 = vmatprep.subr.bf16.mxu1 %v1712_v6  ;;  %v1745_v31 = vld [vmem:[%s2100_s6 + $0xb0] ss:$8 sps:$4 sm:$0xff]   ;;  %v1748_v33 = vld [vmem:[%s2100_s6 + $0xc4] ss:$8 sps:$4 sm:$0xff]   ;;  %v1750_v34 = vld [vmem:[%s2100_s6 + $0x40] ss:$8 sps:$4 sm:$0xff]  }
  0x67   : > { %v1751_v35 = vld [vmem:[%s2100_s6 + $0xc0] ss:$8 sps:$4 sm:$0xff]   ;;  %v1752_v36 = vld [vmem:[%s2100_s6 + $0x54] ss:$8 sps:$4 sm:$0xff]   ;;  %v1756_v38 = vld [vmem:[%s2100_s6 + $0x50] ss:$8 sps:$4 sm:$0xff]  }
  0x68   : > { %v1754_v37 = vld [vmem:[%s2100_s6 + $0xd4] ss:$8 sps:$4 sm:$0xff]   ;;  %v1757_v39 = vld [vmem:[%s2100_s6 + $0xd0] ss:$8 sps:$4 sm:$0xff]   ;;  %v1758_v40 = vld [vmem:[%s2100_s6 + $0x64] ss:$8 sps:$4 sm:$0xff]  }
  0x69   : > { %1506 = vmatpush3.bf16.msra.mxu0 %v1713_v7  ;;  %1622 = vmatpush3.bf16.msra.mxu1 %v1713_v7  ;;  %v1760_v41 = vld [vmem:[%s2100_s6 + $0xe4] ss:$8 sps:$4 sm:$0xff]   ;;  %v1762_v42 = vld [vmem:[%s2100_s6 + $0x60] ss:$8 sps:$4 sm:$0xff]   ;;  %v1764_v44 = vld [vmem:[%s2100_s6 + $0x74] ss:$8 sps:$4 sm:$0xff]  }
  0x6a   : > { %1507 = vmatprep.subr.bf16.mxu0 %v1714_v8  ;;  %1615 = vmatprep.subr.bf16.mxu1 %v1714_v8  ;;  %v1763_v43 = vld [vmem:[%s2100_s6 + $0xe0] ss:$8 sps:$4 sm:$0xff]   ;;  %v1766_v45 = vld [vmem:[%s2100_s6 + $0xf4] ss:$8 sps:$4 sm:$0xff]   ;;  %v1768_v46 = vld [vmem:[%s2100_s6 + $0x70] ss:$8 sps:$4 sm:$0xff]  }
  0x6b   : > { %v1769_v47 = vld [vmem:[%s2100_s6 + $0xf0] ss:$8 sps:$4 sm:$0xff]   ;;  %v2145_v51 = vld [vmem:[%s2255_s2] ss:$0 sm:$0xff] }
  0x6d   : > { %1508 = vmatpush3.bf16.msra.mxu0 %v1715_v9  ;;  %1623 = vmatpush3.bf16.msra.mxu1 %v1715_v9 }
  0x6e   : > { %1509 = vmatprep.subr.bf16.mxu0 %v1716_v10  ;;  %1616 = vmatprep.subr.bf16.mxu1 %v1716_v10 }
  0x71   : > { %1510 = vmatpush3.bf16.msra.mxu0 %v1717_v13  ;;  %1624 = vmatpush3.bf16.msra.mxu1 %v1717_v13 }
  0x72   : > { %1511 = vmatprep.subr.bf16.mxu0 %v1718_v14  ;;  %1617 = vmatprep.subr.bf16.mxu1 %v1718_v14 }
  0x75   : > { %1512 = vmatpush3.bf16.msra.mxu0 %v1719_v15  ;;  %1625 = vmatpush3.bf16.msra.mxu1 %v1719_v15 }
  0x76   : > { %1513 = vmatprep.subr.bf16.mxu0 %v1720_v16  ;;  %1618 = vmatprep.subr.bf16.mxu1 %v1720_v16 }
  0x79   : > { %1514 = vmatpush3.bf16.msra.mxu0 %v1721_v17  ;;  %1626 = vmatpush3.bf16.msra.mxu1 %v1721_v17 }
  0x7c   : > { %681 = vmatmul.mubr.bf16.vlgmr.msra.gmra.mrb[0].mxu0 %v1722_v18  ;;  %745 = vmatmul.mubr.bf16.vlgmr.msra.gmra.mrb[0].mxu1 %v1725_v19 }
  0x7d   : > { %688 = vmatprep.mubr.bf16.mxu0 %v1728_v20  ;;  %752 = vmatprep.mubr.bf16.mxu1 %v1730_v21 }
  0x84   : > { %689 = vmatmul.mubr.bf16.gmra.mrb[4].mxu0 %v1732_v22  ;;  %753 = vmatmul.mubr.bf16.gmra.mrb[4].mxu1 %v1733_v23 }
  0x85   : > { %696 = vmatprep.mubr.bf16.mxu0 %v1734_v24  ;;  %760 = vmatprep.mubr.bf16.mxu1 %v1736_v25 }
  0x8c   : > { %697 = vmatmul.mubr.bf16.gmra.mrb[8].mxu0 %v1738_v26  ;;  %761 = vmatmul.mubr.bf16.gmra.mrb[8].mxu1 %v1739_v27 }
  0x8d   : > { %704 = vmatprep.mubr.bf16.mxu0 %v1740_v28  ;;  %768 = vmatprep.mubr.bf16.mxu1 %v1742_v29 }
  0x94   : > { %705 = vmatmul.mubr.bf16.gmra.mrb[12].mxu0 %v1744_v30  ;;  %769 = vmatmul.mubr.bf16.gmra.mrb[12].mxu1 %v1745_v31 }
  0x95   : > { %712 = vmatprep.mubr.bf16.mxu0 %v1746_v32  ;;  %776 = vmatprep.mubr.bf16.mxu1 %v1748_v33 }
  0x9c   : > { %713 = vmatmul.mubr.bf16.gmra.mrb[16].mxu0 %v1750_v34  ;;  %777 = vmatmul.mubr.bf16.gmra.mrb[16].mxu1 %v1751_v35 }
  0x9d   : > { %720 = vmatprep.mubr.bf16.mxu0 %v1752_v36  ;;  %784 = vmatprep.mubr.bf16.mxu1 %v1754_v37 }
  0xa4   : > { %721 = vmatmul.mubr.bf16.gmra.mrb[20].mxu0 %v1756_v38  ;;  %785 = vmatmul.mubr.bf16.gmra.mrb[20].mxu1 %v1757_v39 }
  0xa5   : > { %728 = vmatprep.mubr.bf16.mxu0 %v1758_v40  ;;  %792 = vmatprep.mubr.bf16.mxu1 %v1760_v41 }
  0xac   : > { %729 = vmatmul.mubr.bf16.gmra.mrb[24].mxu0 %v1762_v42  ;;  %793 = vmatmul.mubr.bf16.gmra.mrb[24].mxu1 %v1763_v43 }
  0xad   : > { %736 = vmatprep.mubr.bf16.mxu0 %v1764_v44  ;;  %800 = vmatprep.mubr.bf16.mxu1 %v1766_v45 }
  0xb4   : > { %737 = vmatmul.mubr.bf16.gmra.mrb[28].mxu0 %v1768_v46  ;;  %801 = vmatmul.mubr.bf16.gmra.mrb[28].mxu1 %v1769_v47 }
 0x14f   : > { %v1515_v48 = vpop.f32.mrb[0].mxu0  ;;  %v1563_v49 = vpop.f32.mrb[0].mxu1 }
 0x150   : > { %v1516_v50 = vpop.f32.mrb[1].mxu0  ;;  %v1564_v52 = vpop.f32.mrb[1].mxu1 }
 0x151   : > { %v1517_v53 = vadd.f32 %v1516_v50, %v1515_v48  ;;  %v1565_v54 = vadd.f32 %v1564_v52, %v1563_v49  ;;  %v1518_v55 = vpop.f32.mrb[2].mxu0  ;;  %v1566_v56 = vpop.f32.mrb[2].mxu1 }
 0x152   : > { %v1519_v57 = vpop.f32.mrb[3].mxu0  ;;  %v1567_v58 = vpop.f32.mrb[3].mxu1 }
 0x153   : > { %v915_v59 = vadd.f32 %v1517_v53, %v2145_v51  ;;  %v931_v60 = vadd.f32 %v1565_v54, %v2145_v51  ;;  %v1520_v61 = vadd.f32 %v1519_v57, %v1518_v55  ;;  %v1568_v62 = vadd.f32 %v1567_v58, %v1566_v56 }
 0x155   : > { %v916_v63 = vadd.f32 %v1520_v61, %v2145_v51  ;;  %v932_v0 = vadd.f32 %v1568_v62, %v2145_v51  ;;  %v947_v1 = vmax.f32 %v915_v59, 0.0  ;;  %v963_v2 = vmax.f32 %v931_v60, 0.0 }
 0x157   : > { %v948_v3 = vmax.f32 %v916_v63, 0.0  ;;  %v964_v4 = vmax.f32 %v932_v0, 0.0  ;;  %v1521_v5 = vpop.f32.mrb[4].mxu0  ;;  %v1569_v6 = vpop.f32.mrb[4].mxu1 }
 0x158   : > { %v1522_v7 = vpop.f32.mrb[5].mxu0  ;;  %v1570_v8 = vpop.f32.mrb[5].mxu1 }
 0x159   : > { %v1407_v9 = vpack.c.bf16 %v948_v3, %v947_v1  ;;  %v1447_v10 = vpack.c.bf16 %v964_v4, %v963_v2  ;;  %v1523_v11 = vadd.f32 %v1522_v7, %v1521_v5  ;;  %v1571_v12 = vadd.f32 %v1570_v8, %v1569_v6  ;;  %v1524_v13 = vpop.f32.mrb[6].mxu0  ;;  %v1572_v14 = vpop.f32.mrb[6].mxu1 }
 0x15a   : > { %v1525_v15 = vpop.f32.mrb[7].mxu0  ;;  %v1573_v16 = vpop.f32.mrb[7].mxu1 }
 0x15b   : > { %1408 = vst [vmem:[%s2152_s9] sm:$0xff] %v1407_v9   ;;  %1491 = vst [vmem:[%s2152_s9 + $0x40] sm:$0xff] %v1447_v10   ;;  %v917_v17 = vadd.f32 %v1523_v11, %v2145_v51  ;;  %v933_v18 = vadd.f32 %v1571_v12, %v2145_v51  ;;  %v1526_v19 = vadd.f32 %v1525_v15, %v1524_v13 }
 0x15c   : > { %v1574_v20 = vadd.f32 %v1573_v16, %v1572_v14 }
 0x15d   : > { %v918_v21 = vadd.f32 %v1526_v19, %v2145_v51  ;;  %v949_v23 = vmax.f32 %v917_v17, 0.0  ;;  %v965_v24 = vmax.f32 %v933_v18, 0.0 }
 0x15e   : > { %v934_v22 = vadd.f32 %v1574_v20, %v2145_v51 }
 0x15f   : > { %v950_v25 = vmax.f32 %v918_v21, 0.0  ;;  %v1527_v27 = vpop.f32.mrb[8].mxu0  ;;  %v1575_v28 = vpop.f32.mrb[8].mxu1 }
 0x160   : > { %v966_v26 = vmax.f32 %v934_v22, 0.0  ;;  %v1528_v29 = vpop.f32.mrb[9].mxu0  ;;  %v1576_v30 = vpop.f32.mrb[9].mxu1 }
 0x161   : > { %v1412_v31 = vpack.c.bf16 %v950_v25, %v949_v23  ;;  %v1529_v33 = vadd.f32 %v1528_v29, %v1527_v27  ;;  %v1577_v34 = vadd.f32 %v1576_v30, %v1575_v28  ;;  %v1530_v35 = vpop.f32.mrb[10].mxu0  ;;  %v1578_v36 = vpop.f32.mrb[10].mxu1 }
 0x162   : > { %v1452_v32 = vpack.c.bf16 %v966_v26, %v965_v24  ;;  %v1531_v37 = vpop.f32.mrb[11].mxu0  ;;  %v1579_v38 = vpop.f32.mrb[11].mxu1 }
 0x163   : > { %1484 = vst [vmem:[%s2152_s9 + $0x8] sm:$0xff] %v1412_v31   ;;  %v919_v39 = vadd.f32 %v1529_v33, %v2145_v51  ;;  %v935_v40 = vadd.f32 %v1577_v34, %v2145_v51  ;;  %v1532_v41 = vadd.f32 %v1531_v37, %v1530_v35  ;;  %v1580_v42 = vadd.f32 %v1579_v38, %v1578_v36 }
 0x164   : > { %1492 = vst [vmem:[%s2152_s9 + $0x48] sm:$0xff] %v1452_v32  }
 0x165   : > { %v920_v43 = vadd.f32 %v1532_v41, %v2145_v51  ;;  %v936_v44 = vadd.f32 %v1580_v42, %v2145_v51  ;;  %v951_v45 = vmax.f32 %v919_v39, 0.0  ;;  %v967_v46 = vmax.f32 %v935_v40, 0.0 }
 0x167   : > { %v952_v47 = vmax.f32 %v920_v43, 0.0  ;;  %v968_v48 = vmax.f32 %v936_v44, 0.0  ;;  %v1533_v49 = vpop.f32.mrb[12].mxu0  ;;  %v1581_v50 = vpop.f32.mrb[12].mxu1 }
 0x168   : > { %v1534_v52 = vpop.f32.mrb[13].mxu0  ;;  %v1582_v53 = vpop.f32.mrb[13].mxu1 }
 0x169   : > { %v1417_v54 = vpack.c.bf16 %v952_v47, %v951_v45  ;;  %v1457_v55 = vpack.c.bf16 %v968_v48, %v967_v46  ;;  %v1535_v56 = vadd.f32 %v1534_v52, %v1533_v49  ;;  %v1583_v57 = vadd.f32 %v1582_v53, %v1581_v50  ;;  %v1536_v58 = vpop.f32.mrb[14].mxu0  ;;  %v1584_v59 = vpop.f32.mrb[14].mxu1 }
 0x16a   : > { %v1537_v60 = vpop.f32.mrb[15].mxu0  ;;  %v1585_v61 = vpop.f32.mrb[15].mxu1 }
 0x16b   : > { %1485 = vst [vmem:[%s2152_s9 + $0x10] sm:$0xff] %v1417_v54   ;;  %1493 = vst [vmem:[%s2152_s9 + $0x50] sm:$0xff] %v1457_v55   ;;  %v921_v62 = vadd.f32 %v1535_v56, %v2145_v51  ;;  %v937_v63 = vadd.f32 %v1583_v57, %v2145_v51  ;;  %v1538_v0 = vadd.f32 %v1537_v60, %v1536_v58 }
 0x16c   : > { %v1586_v1 = vadd.f32 %v1585_v61, %v1584_v59 }
 0x16d   : > { %v922_v2 = vadd.f32 %v1538_v0, %v2145_v51  ;;  %v953_v4 = vmax.f32 %v921_v62, 0.0  ;;  %v969_v5 = vmax.f32 %v937_v63, 0.0 }
 0x16e   : > { %v938_v3 = vadd.f32 %v1586_v1, %v2145_v51 }
 0x16f   : > { %v954_v6 = vmax.f32 %v922_v2, 0.0  ;;  %v1539_v8 = vpop.f32.mrb[16].mxu0  ;;  %v1587_v9 = vpop.f32.mrb[16].mxu1 }
 0x170   : > { %v970_v7 = vmax.f32 %v938_v3, 0.0  ;;  %v1540_v10 = vpop.f32.mrb[17].mxu0  ;;  %v1588_v11 = vpop.f32.mrb[17].mxu1 }
 0x171   : > { %v1422_v12 = vpack.c.bf16 %v954_v6, %v953_v4  ;;  %v1541_v14 = vadd.f32 %v1540_v10, %v1539_v8  ;;  %v1589_v15 = vadd.f32 %v1588_v11, %v1587_v9  ;;  %v1542_v16 = vpop.f32.mrb[18].mxu0  ;;  %v1590_v17 = vpop.f32.mrb[18].mxu1 }
 0x172   : > { %v1462_v13 = vpack.c.bf16 %v970_v7, %v969_v5  ;;  %v1543_v18 = vpop.f32.mrb[19].mxu0  ;;  %v1591_v19 = vpop.f32.mrb[19].mxu1 }
 0x173   : > { %1486 = vst [vmem:[%s2152_s9 + $0x18] sm:$0xff] %v1422_v12   ;;  %v923_v20 = vadd.f32 %v1541_v14, %v2145_v51  ;;  %v939_v21 = vadd.f32 %v1589_v15, %v2145_v51  ;;  %v1544_v22 = vadd.f32 %v1543_v18, %v1542_v16  ;;  %v1592_v23 = vadd.f32 %v1591_v19, %v1590_v17 }
 0x174   : > { %1494 = vst [vmem:[%s2152_s9 + $0x58] sm:$0xff] %v1462_v13  }
 0x175   : > { %v924_v24 = vadd.f32 %v1544_v22, %v2145_v51  ;;  %v940_v25 = vadd.f32 %v1592_v23, %v2145_v51  ;;  %v955_v26 = vmax.f32 %v923_v20, 0.0  ;;  %v971_v27 = vmax.f32 %v939_v21, 0.0 }
 0x177   : > { %v956_v28 = vmax.f32 %v924_v24, 0.0  ;;  %v972_v29 = vmax.f32 %v940_v25, 0.0  ;;  %v1545_v30 = vpop.f32.mrb[20].mxu0  ;;  %v1593_v31 = vpop.f32.mrb[20].mxu1 }
 0x178   : > { %v1546_v32 = vpop.f32.mrb[21].mxu0  ;;  %v1594_v33 = vpop.f32.mrb[21].mxu1 }
 0x179   : > { %v1427_v34 = vpack.c.bf16 %v956_v28, %v955_v26  ;;  %v1467_v35 = vpack.c.bf16 %v972_v29, %v971_v27  ;;  %v1547_v36 = vadd.f32 %v1546_v32, %v1545_v30  ;;  %v1595_v37 = vadd.f32 %v1594_v33, %v1593_v31  ;;  %v1548_v38 = vpop.f32.mrb[22].mxu0  ;;  %v1596_v39 = vpop.f32.mrb[22].mxu1 }
 0x17a   : > { %v1549_v40 = vpop.f32.mrb[23].mxu0  ;;  %v1597_v41 = vpop.f32.mrb[23].mxu1 }
 0x17b   : > { %1487 = vst [vmem:[%s2152_s9 + $0x20] sm:$0xff] %v1427_v34   ;;  %1495 = vst [vmem:[%s2152_s9 + $0x60] sm:$0xff] %v1467_v35   ;;  %v925_v42 = vadd.f32 %v1547_v36, %v2145_v51  ;;  %v941_v43 = vadd.f32 %v1595_v37, %v2145_v51  ;;  %v1550_v44 = vadd.f32 %v1549_v40, %v1548_v38 }
 0x17c   : > { %v1598_v45 = vadd.f32 %v1597_v41, %v1596_v39 }
 0x17d   : > { %v926_v46 = vadd.f32 %v1550_v44, %v2145_v51  ;;  %v957_v48 = vmax.f32 %v925_v42, 0.0  ;;  %v973_v49 = vmax.f32 %v941_v43, 0.0 }
 0x17e   : > { %v942_v47 = vadd.f32 %v1598_v45, %v2145_v51 }
 0x17f   : > { %v958_v50 = vmax.f32 %v926_v46, 0.0  ;;  %v1551_v53 = vpop.f32.mrb[24].mxu0  ;;  %v1599_v54 = vpop.f32.mrb[24].mxu1 }
 0x180   : > { %v974_v52 = vmax.f32 %v942_v47, 0.0  ;;  %v1552_v55 = vpop.f32.mrb[25].mxu0  ;;  %v1600_v56 = vpop.f32.mrb[25].mxu1 }
 0x181   : > { %v1432_v57 = vpack.c.bf16 %v958_v50, %v957_v48  ;;  %v1553_v59 = vadd.f32 %v1552_v55, %v1551_v53  ;;  %v1601_v60 = vadd.f32 %v1600_v56, %v1599_v54  ;;  %v1554_v61 = vpop.f32.mrb[26].mxu0  ;;  %v1602_v62 = vpop.f32.mrb[26].mxu1 }
 0x182   : > { %v1472_v58 = vpack.c.bf16 %v974_v52, %v973_v49  ;;  %v1555_v63 = vpop.f32.mrb[27].mxu0  ;;  %v1603_v0 = vpop.f32.mrb[27].mxu1 }
 0x183   : > { %1488 = vst [vmem:[%s2152_s9 + $0x28] sm:$0xff] %v1432_v57   ;;  %v927_v1 = vadd.f32 %v1553_v59, %v2145_v51  ;;  %v943_v2 = vadd.f32 %v1601_v60, %v2145_v51  ;;  %v1556_v3 = vadd.f32 %v1555_v63, %v1554_v61  ;;  %v1604_v4 = vadd.f32 %v1603_v0, %v1602_v62 }
 0x184   : > { %1496 = vst [vmem:[%s2152_s9 + $0x68] sm:$0xff] %v1472_v58  }
 0x185   : > { %v928_v5 = vadd.f32 %v1556_v3, %v2145_v51  ;;  %v944_v6 = vadd.f32 %v1604_v4, %v2145_v51  ;;  %v959_v7 = vmax.f32 %v927_v1, 0.0  ;;  %v975_v8 = vmax.f32 %v943_v2, 0.0 }
 0x187   : > { %v960_v9 = vmax.f32 %v928_v5, 0.0  ;;  %v976_v10 = vmax.f32 %v944_v6, 0.0  ;;  %v1557_v11 = vpop.f32.mrb[28].mxu0  ;;  %v1605_v12 = vpop.f32.mrb[28].mxu1 }
 0x188   : > { %v1558_v13 = vpop.f32.mrb[29].mxu0  ;;  %v1606_v14 = vpop.f32.mrb[29].mxu1 }
 0x189   : > { %v1437_v15 = vpack.c.bf16 %v960_v9, %v959_v7  ;;  %v1477_v16 = vpack.c.bf16 %v976_v10, %v975_v8  ;;  %v1559_v17 = vadd.f32 %v1558_v13, %v1557_v11  ;;  %v1607_v18 = vadd.f32 %v1606_v14, %v1605_v12  ;;  %v1560_v19 = vpop.f32.mrb[30].mxu0  ;;  %v1608_v20 = vpop.f32.mrb[30].mxu1 }
 0x18a   : > { %v1561_v21 = vpop.f32.mrb[31].mxu0  ;;  %v1609_v22 = vpop.f32.mrb[31].mxu1 }
 0x18b   : > { %1489 = vst [vmem:[%s2152_s9 + $0x30] sm:$0xff] %v1437_v15   ;;  %1497 = vst [vmem:[%s2152_s9 + $0x70] sm:$0xff] %v1477_v16   ;;  %v929_v23 = vadd.f32 %v1559_v17, %v2145_v51  ;;  %v945_v24 = vadd.f32 %v1607_v18, %v2145_v51  ;;  %v1562_v25 = vadd.f32 %v1561_v21, %v1560_v19 }
 0x18c   : > { %v1610_v26 = vadd.f32 %v1609_v22, %v1608_v20 }
 0x18d   : > { %v930_v27 = vadd.f32 %v1562_v25, %v2145_v51  ;;  %v961_v29 = vmax.f32 %v929_v23, 0.0  ;;  %v977_v30 = vmax.f32 %v945_v24, 0.0 }
 0x18e   : > { %v946_v28 = vadd.f32 %v1610_v26, %v2145_v51 }
 0x18f   : > { %v962_v31 = vmax.f32 %v930_v27, 0.0 }
 0x190   : > { %v978_v32 = vmax.f32 %v946_v28, 0.0 }
 0x191   : > { %v1442_v33 = vpack.c.bf16 %v962_v31, %v961_v29 }
 0x192   : > { %v1482_v34 = vpack.c.bf16 %v978_v32, %v977_v30 }
 0x193   : > { %1490 = vst [vmem:[%s2152_s9 + $0x38] sm:$0xff] %v1442_v33  }
 0x194   : > { %1498 = vst [vmem:[%s2152_s9 + $0x78] sm:$0xff] %v1482_v34  }
 0x195   : > { %1841 = shalt.err (!%p1838_p5)
}
 0x196   : > { %s1842_s29 = scalar_lea.hbm %s2201_s7, 2048  ;;  %s1846_s20 = scalar_lea.hbm %s2256_s3, 16384 }
 0x197   : > { %p1843_p9 = scmp.ne.s32.totalorder %s2201_s7, %s1842_s29  ;;  %p1847_p3 = scmp.lt.u32.totalorder %s2201_s7, %s2256_s3 }
 0x198   : > { %p1848_p7 = scmp.lt.u32.totalorder %s1846_s20, %s1842_s29  ;;  %p1850_p4 = scmp.lt.u32.totalorder %s1842_s29, %s2201_s7 }
 0x199   : > { %p1844_p1 = pnand %p1843_p9, %p2040_p11 }
 0x19a   : > { %p1849_p13 = por %p1848_p7, %p1847_p3 }
 0x19b   : > { %p1845_p2 = pneg %p1844_p1 }
 0x19c   : > { %p1851_p6 = por %p1850_p4, %p1849_p13 }
 0x19e   : > { %p1852_p8 = pnand %p1851_p6, %p1845_p2 }
 0x1a0   : > { %1855 = shalt.err (!%p1852_p8)
}
 0x1a1   : > { %s1923_s9 = smov 64   ;;  %s1924_s10 = smov 4  }
 0x1a2   : > { %1633 = dma.vmem_to_hbm [thread:$0]  (%p2040_p11), %s2203_s11, 2048, %s2201_s7, %s1140_s15, %s1923_s9, %s1923_s9, %s1924_s10  }
 0x1a3 PF: > { %p1650_p12 = scmp.ge.s32.totalorder %s1914_s17, 2  ;;  %s1169_s18 = sand.u32 1, %s1894_s12  }
 0x1a4   : > { %p2274_p10 = scmp.ne.s32.totalorder %s2264_s23, 0  ;;  %s1170_s26 = scalar_lea.sflag [#allocation5], %s1169_s18 }
 0x1a6   : > { %p1644_p0 = pnand %p1650_p12, %p2274_p10 }
 0x1a8   : > { %1889 = dma.done.wait (!%p1644_p0), %s1170_s26, 2048  }
 0x1a9   : > { %1891 = vsyncadd (!%p1644_p0), %s1170_s26, 4294965248  ;;  %s20_s17 = sadd.s32 1, %s1914_s17   ;;  %s2275_s12 = smov %s1898_s13 }
 0x1aa   : > { %p17_p5 = scmp.ge.s32.totalorder %s20_s17, 10   ;;  %s2276_s13 = smov %s1902_s14 }
 0x1ab   : > { %s2277_s14 = smov %s2049_s5  ;;  %s2278_s15 = smov %s1910_s16 }
 0x1ac   : > { %s2279_s16 = smov %s2281_s28  ;;  %19 = sbr.rel (!%p17_p5) target bundleno = 7 (0x7), region = 93 }
 0x1b3   :  { %1175 = vsyncpa [#allocation4], 1 }
 0x1b4   :  { %1177 = vsyncpa [#allocation4 + $0x1], 1 }
 0x1b5   :  { %1178 = vsyncpa [#allocation7], 1 }
 0x1b6   :  { %1179 = vsyncpa [#allocation5], 1 }
 0x1b7   :  { %1181 = vsyncpa [#allocation5 + $0x1], 1 }

</bundles_post_ra>
